<compile_context>
chip_gen: v7x
topology: tpu7x:2x2x1
jax: 0.10.0
libtpu: 0.0.40
codegen_flags: <defaults>
</compile_context>

<pallas_src>
import numpy as np
import jax
import jax.numpy as jnp
from jax.experimental import pallas as pl
from jax.experimental.pallas import tpu as pltpu

# ----------------------------- configuration --------------------------------
COUPLING = 4         # number of coupling layers
HIDDEN = 2           # hidden layers per coupling MLP
IN_OUT_DIM = 16      # feature dimension D (must be even)
MID_DIM = 32         # MLP width
BATCH = 8
DEFAULT_TILE_B = 4096   # lane-dense batch tile; multiple of 256 (sweep 2048-8192)


def _round_up(n, m):
    return ((n + m - 1) // m) * m


# ------------------------------- kernel -------------------------------------
def nice_forward_kernel(logdet_ref, x_ref, w1_ref, wh_ref, wo_ref, bias_ref,
                        escale_ref, ll_ref):
    """NICE log-likelihood for one (D, TILE_B) feature-major batch tile.

    logdet_ref: (1, 1) SMEM        -- sum(scale) - log(256)*D (hoisted)
    x_ref:      (D, TILE_B) f32    -- feature-major: batch on the lane axis
    w1_ref:     (C, M, D/2)  bf16
    wh_ref:     (C, H-1, M, M) bf16
    wo_ref:     (C, D/2, M)  bf16
    bias_ref:   (C, H*M + D/2, 1) f32  -- [b1 | bh... | bo] stacked per layer
    escale_ref: (D, 1) f32         -- exp(scale) (hoisted)
    ll_ref:     (1, TILE_B) f32    -- lane-dense output
    """
    D = x_ref.shape[0]
    half = D // 2
    M = MID_DIM

    x = x_ref[...]                         # f32, batch on lanes
    xa = x[:half, :]                       # sublane-aligned half splits (offsets 0, 8)
    xb = x[half:, :]

    # ---- additive coupling layers (static unroll; log|det| contribution = 0) ----
    # bf16 operands at every dot (single-pass MXU), f32 accumulation.
    for c in range(COUPLING):
        x1, x2 = (xa, xb) if c % 2 == 0 else (xb, xa)

        # perf note: the K=8 first layer could be done as 8 VPU broadcast-FMA
        # outer products to free the MXU (v6e/v7x); kept on the MXU for simplicity.
        h = jnp.dot(w1_ref[c], x1.astype(jnp.bfloat16),
                    preferred_element_type=jnp.float32) + bias_ref[c, :M, :]
        h = jnp.maximum(h, 0.0)
        for j in range(HIDDEN - 1):
            h = (jnp.dot(wh_ref[c, j], h.astype(jnp.bfloat16),
                         preferred_element_type=jnp.float32)
                 + bias_ref[c, M * (1 + j):M * (2 + j), :])
            h = jnp.maximum(h, 0.0)
        shift = (jnp.dot(wo_ref[c], h.astype(jnp.bfloat16),
                         preferred_element_type=jnp.float32)
                 + bias_ref[c, M * HIDDEN:, :])

        x2 = x2 + shift
        if c % 2 == 0:
            xa, xb = x1, x2
        else:
            xb, xa = x1, x2

    # ---- diagonal scaling z = x * exp(s), exp hoisted to wrapper ----
    z = jnp.concatenate([xa, xb], axis=0) * escale_ref[...]       # (D, TILE_B)

    # ---- standard-logistic prior: log p(z) = -|z| - 2*log(1 + exp(-|z|)) ----
    az = jnp.abs(z)
    lp = -az - 2.0 * jnp.log(1.0 + jnp.exp(-az))
    ll = jnp.sum(lp, axis=0, keepdims=True)                       # (1, TILE_B)

    ll_ref[...] = ll + logdet_ref[0, 0]


# --------------------- one-time parameter preparation ------------------------
def prepare_params(params):
    """Hoisted, kernel-layout parameters (call once, outside the hot loop)."""
    C, H, M, D = COUPLING, HIDDEN, MID_DIM, IN_OUT_DIM
    w1 = jnp.transpose(params["w1"], (0, 2, 1)).astype(jnp.bfloat16)      # (C, M, D/2)
    wh = jnp.transpose(params["wh"], (0, 1, 3, 2)).astype(jnp.bfloat16)   # (C, H-1, M, M)
    wo = jnp.transpose(params["wo"], (0, 2, 1)).astype(jnp.bfloat16)      # (C, D/2, M)
    bias = jnp.concatenate(
        [jnp.transpose(params["b1"], (0, 2, 1)),                          # (C, M, 1)
         jnp.transpose(params["bh"], (0, 1, 3, 2)).reshape(C, (H - 1) * M, 1),
         jnp.transpose(params["bo"], (0, 2, 1))],                         # (C, D/2, 1)
        axis=1).astype(jnp.float32)                                       # (C, H*M + D/2, 1)
    escale = jnp.exp(params["scale"]).astype(jnp.float32).T               # (D, 1)
    logdet = (jnp.sum(params["scale"])
              - np.log(256.0) * D).astype(jnp.float32).reshape(1, 1)      # (1, 1)
    return {"w1": w1, "wh": wh, "wo": wo, "bias": bias,
            "escale": escale, "logdet": logdet}


# ------------------------------ wrapper --------------------------------------
def nice_log_prob(x, kp, tile_b=DEFAULT_TILE_B):
    B, D = x.shape

    # Lane-dense batch tile, multiple of 256 (keeps both 256-wide MXUs engaged);
    # large tiles amortize per-step overhead; VMEM footprint stays tiny (<1 MiB).
    tile_b = min(tile_b, _round_up(B, 256))
    if B >= 512:
        # ensure >= 2 grid steps so dimension_semantics=("parallel",) can shard
        # the batch over both TensorCores on v7x (harmless on v5e/v6e).
        tile_b = min(tile_b, _round_up(_round_up(B, 256) // 2, 256))

    n_steps = pl.cdiv(B, tile_b)
    b_out = n_steps * tile_b

    # Feature-major view: batch on the 128-lane axis, D/2 split sublane-aligned.
    # No batch padding -- the edge block is handled by Pallas partial-block DMA
    # and masked stores.  (For a training loop, stage the data feature-major
    # once outside the hot loop to drop this per-call transpose as well.)
    xt = x.astype(jnp.float32).T                                  # (D, B)

    in_specs = [
        pl.BlockSpec(memory_space=pltpu.MemorySpace.SMEM),        # log-det scalar
        pl.BlockSpec((D, tile_b), lambda i: (0, i)),              # x tile
        # weights/biases: full blocks, constant index maps -> VMEM-resident.
        pl.BlockSpec(kp["w1"].shape, lambda i: (0, 0, 0)),
        pl.BlockSpec(kp["wh"].shape, lambda i: (0, 0, 0, 0)),
        pl.BlockSpec(kp["wo"].shape, lambda i: (0, 0, 0)),
        pl.BlockSpec(kp["bias"].shape, lambda i: (0, 0, 0)),
        pl.BlockSpec(kp["escale"].shape, lambda i: (0, 0)),
    ]
    out_spec = pl.BlockSpec((1, tile_b), lambda i: (0, i))        # lane-dense output

    out = pl.pallas_call(
        nice_forward_kernel,
        out_shape=jax.ShapeDtypeStruct((1, b_out), jnp.float32),
        grid=(n_steps,),
        in_specs=in_specs,
        out_specs=out_spec,
        compiler_params=pltpu.CompilerParams(
            dimension_semantics=("parallel",)),
    )(kp["logdet"], xt, kp["w1"], kp["wh"], kp["wo"], kp["bias"], kp["escale"])

    return out[0, :B]


# --------------------- deterministic parameter init --------------------------
def init_params(key):
    half = IN_OUT_DIM // 2
    ks = jax.random.split(key, 4)
    scale_in = 1.0 / np.sqrt(half)
    scale_mid = 1.0 / np.sqrt(MID_DIM)
    return {
        "w1": jax.random.normal(ks[0], (COUPLING, half, MID_DIM), jnp.float32) * scale_in,
        "b1": jnp.zeros((COUPLING, 1, MID_DIM), jnp.float32),
        "wh": jax.random.normal(ks[1], (COUPLING, HIDDEN - 1, MID_DIM, MID_DIM),
                                jnp.float32) * scale_mid,
        "bh": jnp.zeros((COUPLING, HIDDEN - 1, 1, MID_DIM), jnp.float32),
        "wo": jax.random.normal(ks[2], (COUPLING, MID_DIM, half), jnp.float32) * scale_mid,
        "bo": jnp.zeros((COUPLING, 1, half), jnp.float32),
        "scale": jax.random.normal(ks[3], (1, IN_OUT_DIM), jnp.float32) * 0.01,
    }


# ---------------------- pure-JAX reference (for checking) --------------------
def nice_log_prob_ref(x, params):
    half = IN_OUT_DIM // 2
    xa, xb = x[:, :half], x[:, half:]
    for c in range(COUPLING):
        x1, x2 = (xa, xb) if c % 2 == 0 else (xb, xa)
        h = jnp.maximum(x1 @ params["w1"][c] + params["b1"][c], 0.0)
        for j in range(HIDDEN - 1):
            h = jnp.maximum(h @ params["wh"][c, j] + params["bh"][c, j], 0.0)
        x2 = x2 + (h @ params["wo"][c] + params["bo"][c])
        if c % 2 == 0:
            xa, xb = x1, x2
        else:
            xb, xa = x1, x2
    s = params["scale"]
    z = jnp.concatenate([xa, xb], axis=1) * jnp.exp(s)
    log_det = jnp.sum(s) - np.log(256.0) * IN_OUT_DIM
    lp = -z - 2.0 * jax.nn.softplus(-z)
    return jnp.sum(lp, axis=1) + log_det


# ---------------------------------- main --------------------------------------
if __name__ == "__main__":
    key = jax.random.PRNGKey(0)
    k_x, k_p = jax.random.split(key)
    # "data" in [0, 1] like dequantized images
    x = jax.nn.sigmoid(jax.random.normal(k_x, (BATCH, IN_OUT_DIM), jnp.float32))
    params = init_params(k_p)
    kp = prepare_params(params)

    ll = jax.block_until_ready(nice_log_prob(x, kp))
    ll_ref = jax.block_until_ready(nice_log_prob_ref(x, params))

    # bf16 matmul operands loosen the tolerance slightly vs. pure f32.
    np.testing.assert_allclose(np.asarray(ll), np.asarray(ll_ref),
                               rtol=1e-2, atol=1e-2)

    # TODO(synk): f_inverse / sample() (inverse flow + prior sampling) are not part
    # of forward() and are not implemented as kernels.
    print("KERNEL_OK")
</pallas_src>

<mosaic_0001>
module attributes {stable_mosaic.version = 11 : i64} {
  func.func @nice_forward_kernel(%arg0: i32, %arg1: memref<1x1xf32, #tpu.memory_space<smem>>, %arg2: memref<16x256xf32, #tpu.memory_space<vmem>>, %arg3: memref<4x32x8xbf16, #tpu.memory_space<vmem>>, %arg4: memref<4x1x32x32xbf16, #tpu.memory_space<vmem>>, %arg5: memref<4x8x32xbf16, #tpu.memory_space<vmem>>, %arg6: memref<4x72x1xf32, #tpu.memory_space<vmem>>, %arg7: memref<16x1xf32, #tpu.memory_space<vmem>>, %arg8: memref<1x256xf32, #tpu.memory_space<vmem>>) attributes {dimension_semantics = [#tpu.dimension_semantics<parallel>], iteration_bounds = array<i64: 1>, scalar_prefetch = 0 : i64, scratch_operands = 0 : i64, tpu.core_type = #tpu.core_type<tc>, window_params = [{transform_indices = @transform_0, window_bounds = array<i64: 1, 1>}, {transform_indices = @transform_1, window_bounds = array<i64: 16, 256>}, {pipeline_mode = #tpu.pipeline_mode<synchronous>, transform_indices = @transform_2, window_bounds = array<i64: 4, 32, 8>}, {pipeline_mode = #tpu.pipeline_mode<synchronous>, transform_indices = @transform_3, window_bounds = array<i64: 4, 1, 32, 32>}, {pipeline_mode = #tpu.pipeline_mode<synchronous>, transform_indices = @transform_4, window_bounds = array<i64: 4, 8, 32>}, {pipeline_mode = #tpu.pipeline_mode<synchronous>, transform_indices = @transform_5, window_bounds = array<i64: 4, 72, 1>}, {pipeline_mode = #tpu.pipeline_mode<synchronous>, transform_indices = @transform_6, window_bounds = array<i64: 16, 1>}, {transform_indices = @transform_7, window_bounds = array<i64: 1, 256>}]} {
    %c0 = arith.constant 0 : index
    %c0_0 = arith.constant 0 : index
    %0 = vector.load %arg2[%c0, %c0_0] : memref<16x256xf32, #tpu.memory_space<vmem>>, vector<16x256xf32>
    %1 = vector.extract_strided_slice %0 {offsets = [0, 0], sizes = [8, 256], strides = [1, 1]} : vector<16x256xf32> to vector<8x256xf32>
    %2 = vector.extract_strided_slice %0 {offsets = [8, 0], sizes = [8, 256], strides = [1, 1]} : vector<16x256xf32> to vector<8x256xf32>
    %c0_1 = arith.constant 0 : index
    %c0_2 = arith.constant 0 : index
    %c0_3 = arith.constant 0 : index
    %3 = vector.load %arg3[%c0_1, %c0_2, %c0_3] : memref<4x32x8xbf16, #tpu.memory_space<vmem>>, vector<1x32x8xbf16>
    %4 = vector.shape_cast %3 : vector<1x32x8xbf16> to vector<32x8xbf16>
    %5 = arith.truncf %1 : vector<8x256xf32> to vector<8x256xbf16>
    %cst = arith.constant dense<0.000000e+00> : vector<32x256xf32>
    %6 = tpu.matmul %4, %5, %cst {dimension_numbers = #tpu.dot_dimension_numbers<[1], [0], [0], [1], [0, 0, 1, 1], [], []>} : vector<32x8xbf16>, vector<8x256xbf16>, vector<32x256xf32> -> vector<32x256xf32>
    %c0_4 = arith.constant 0 : index
    %c0_5 = arith.constant 0 : index
    %c0_6 = arith.constant 0 : index
    %7 = vector.load %arg6[%c0_4, %c0_5, %c0_6] : memref<4x72x1xf32, #tpu.memory_space<vmem>>, vector<1x32x1xf32>
    %8 = vector.shape_cast %7 : vector<1x32x1xf32> to vector<32x1xf32>
    %9 = vector.broadcast %8 : vector<32x1xf32> to vector<32x256xf32>
    %10 = arith.addf %6, %9 : vector<32x256xf32>
    %cst_7 = arith.constant 0.000000e+00 : f32
    %11 = vector.broadcast %cst_7 : f32 to vector<32x256xf32>
    %12 = arith.maximumf %10, %11 : vector<32x256xf32>
    %c0_8 = arith.constant 0 : index
    %c0_9 = arith.constant 0 : index
    %c0_10 = arith.constant 0 : index
    %c0_11 = arith.constant 0 : index
    %13 = vector.load %arg4[%c0_8, %c0_9, %c0_10, %c0_11] : memref<4x1x32x32xbf16, #tpu.memory_space<vmem>>, vector<1x1x32x32xbf16>
    %14 = vector.shape_cast %13 : vector<1x1x32x32xbf16> to vector<32x32xbf16>
    %15 = arith.truncf %12 : vector<32x256xf32> to vector<32x256xbf16>
    %cst_12 = arith.constant dense<0.000000e+00> : vector<32x256xf32>
    %16 = tpu.matmul %14, %15, %cst_12 {dimension_numbers = #tpu.dot_dimension_numbers<[1], [0], [0], [1], [0, 0, 1, 1], [], []>} : vector<32x32xbf16>, vector<32x256xbf16>, vector<32x256xf32> -> vector<32x256xf32>
    %c0_13 = arith.constant 0 : index
    %c32 = arith.constant 32 : index
    %c0_14 = arith.constant 0 : index
    %17 = vector.load %arg6[%c0_13, %c32, %c0_14] : memref<4x72x1xf32, #tpu.memory_space<vmem>>, vector<1x32x1xf32>
    %18 = vector.shape_cast %17 : vector<1x32x1xf32> to vector<32x1xf32>
    %19 = vector.broadcast %18 : vector<32x1xf32> to vector<32x256xf32>
    %20 = arith.addf %16, %19 : vector<32x256xf32>
    %cst_15 = arith.constant 0.000000e+00 : f32
    %21 = vector.broadcast %cst_15 : f32 to vector<32x256xf32>
    %22 = arith.maximumf %20, %21 : vector<32x256xf32>
    %c0_16 = arith.constant 0 : index
    %c0_17 = arith.constant 0 : index
    %c0_18 = arith.constant 0 : index
    %23 = vector.load %arg5[%c0_16, %c0_17, %c0_18] : memref<4x8x32xbf16, #tpu.memory_space<vmem>>, vector<1x8x32xbf16>
    %24 = vector.shape_cast %23 : vector<1x8x32xbf16> to vector<8x32xbf16>
    %25 = arith.truncf %22 : vector<32x256xf32> to vector<32x256xbf16>
    %cst_19 = arith.constant dense<0.000000e+00> : vector<8x256xf32>
    %26 = tpu.matmul %24, %25, %cst_19 {dimension_numbers = #tpu.dot_dimension_numbers<[1], [0], [0], [1], [0, 0, 1, 1], [], []>} : vector<8x32xbf16>, vector<32x256xbf16>, vector<8x256xf32> -> vector<8x256xf32>
    %c0_20 = arith.constant 0 : index
    %c64 = arith.constant 64 : index
    %c0_21 = arith.constant 0 : index
    %27 = vector.load %arg6[%c0_20, %c64, %c0_21] : memref<4x72x1xf32, #tpu.memory_space<vmem>>, vector<1x8x1xf32>
    %28 = vector.shape_cast %27 : vector<1x8x1xf32> to vector<8x1xf32>
    %29 = vector.broadcast %28 : vector<8x1xf32> to vector<8x256xf32>
    %30 = arith.addf %26, %29 : vector<8x256xf32>
    %31 = arith.addf %2, %30 : vector<8x256xf32>
    %c1 = arith.constant 1 : index
    %c0_22 = arith.constant 0 : index
    %c0_23 = arith.constant 0 : index
    %32 = vector.load %arg3[%c1, %c0_22, %c0_23] : memref<4x32x8xbf16, #tpu.memory_space<vmem>>, vector<1x32x8xbf16>
    %33 = vector.shape_cast %32 : vector<1x32x8xbf16> to vector<32x8xbf16>
    %34 = arith.truncf %31 : vector<8x256xf32> to vector<8x256xbf16>
    %cst_24 = arith.constant dense<0.000000e+00> : vector<32x256xf32>
    %35 = tpu.matmul %33, %34, %cst_24 {dimension_numbers = #tpu.dot_dimension_numbers<[1], [0], [0], [1], [0, 0, 1, 1], [], []>} : vector<32x8xbf16>, vector<8x256xbf16>, vector<32x256xf32> -> vector<32x256xf32>
    %c1_25 = arith.constant 1 : index
    %c0_26 = arith.constant 0 : index
    %c0_27 = arith.constant 0 : index
    %36 = vector.load %arg6[%c1_25, %c0_26, %c0_27] : memref<4x72x1xf32, #tpu.memory_space<vmem>>, vector<1x32x1xf32>
    %37 = vector.shape_cast %36 : vector<1x32x1xf32> to vector<32x1xf32>
    %38 = vector.broadcast %37 : vector<32x1xf32> to vector<32x256xf32>
    %39 = arith.addf %35, %38 : vector<32x256xf32>
    %cst_28 = arith.constant 0.000000e+00 : f32
    %40 = vector.broadcast %cst_28 : f32 to vector<32x256xf32>
    %41 = arith.maximumf %39, %40 : vector<32x256xf32>
    %c1_29 = arith.constant 1 : index
    %c0_30 = arith.constant 0 : index
    %c0_31 = arith.constant 0 : index
    %c0_32 = arith.constant 0 : index
    %42 = vector.load %arg4[%c1_29, %c0_30, %c0_31, %c0_32] : memref<4x1x32x32xbf16, #tpu.memory_space<vmem>>, vector<1x1x32x32xbf16>
    %43 = vector.shape_cast %42 : vector<1x1x32x32xbf16> to vector<32x32xbf16>
    %44 = arith.truncf %41 : vector<32x256xf32> to vector<32x256xbf16>
    %cst_33 = arith.constant dense<0.000000e+00> : vector<32x256xf32>
    %45 = tpu.matmul %43, %44, %cst_33 {dimension_numbers = #tpu.dot_dimension_numbers<[1], [0], [0], [1], [0, 0, 1, 1], [], []>} : vector<32x32xbf16>, vector<32x256xbf16>, vector<32x256xf32> -> vector<32x256xf32>
    %c1_34 = arith.constant 1 : index
    %c32_35 = arith.constant 32 : index
    %c0_36 = arith.constant 0 : index
    %46 = vector.load %arg6[%c1_34, %c32_35, %c0_36] : memref<4x72x1xf32, #tpu.memory_space<vmem>>, vector<1x32x1xf32>
    %47 = vector.shape_cast %46 : vector<1x32x1xf32> to vector<32x1xf32>
    %48 = vector.broadcast %47 : vector<32x1xf32> to vector<32x256xf32>
    %49 = arith.addf %45, %48 : vector<32x256xf32>
    %cst_37 = arith.constant 0.000000e+00 : f32
    %50 = vector.broadcast %cst_37 : f32 to vector<32x256xf32>
    %51 = arith.maximumf %49, %50 : vector<32x256xf32>
    %c1_38 = arith.constant 1 : index
    %c0_39 = arith.constant 0 : index
    %c0_40 = arith.constant 0 : index
    %52 = vector.load %arg5[%c1_38, %c0_39, %c0_40] : memref<4x8x32xbf16, #tpu.memory_space<vmem>>, vector<1x8x32xbf16>
    %53 = vector.shape_cast %52 : vector<1x8x32xbf16> to vector<8x32xbf16>
    %54 = arith.truncf %51 : vector<32x256xf32> to vector<32x256xbf16>
    %cst_41 = arith.constant dense<0.000000e+00> : vector<8x256xf32>
    %55 = tpu.matmul %53, %54, %cst_41 {dimension_numbers = #tpu.dot_dimension_numbers<[1], [0], [0], [1], [0, 0, 1, 1], [], []>} : vector<8x32xbf16>, vector<32x256xbf16>, vector<8x256xf32> -> vector<8x256xf32>
    %c1_42 = arith.constant 1 : index
    %c64_43 = arith.constant 64 : index
    %c0_44 = arith.constant 0 : index
    %56 = vector.load %arg6[%c1_42, %c64_43, %c0_44] : memref<4x72x1xf32, #tpu.memory_space<vmem>>, vector<1x8x1xf32>
    %57 = vector.shape_cast %56 : vector<1x8x1xf32> to vector<8x1xf32>
    %58 = vector.broadcast %57 : vector<8x1xf32> to vector<8x256xf32>
    %59 = arith.addf %55, %58 : vector<8x256xf32>
    %60 = arith.addf %1, %59 : vector<8x256xf32>
    %c2 = arith.constant 2 : index
    %c0_45 = arith.constant 0 : index
    %c0_46 = arith.constant 0 : index
    %61 = vector.load %arg3[%c2, %c0_45, %c0_46] : memref<4x32x8xbf16, #tpu.memory_space<vmem>>, vector<1x32x8xbf16>
    %62 = vector.shape_cast %61 : vector<1x32x8xbf16> to vector<32x8xbf16>
    %63 = arith.truncf %60 : vector<8x256xf32> to vector<8x256xbf16>
    %cst_47 = arith.constant dense<0.000000e+00> : vector<32x256xf32>
    %64 = tpu.matmul %62, %63, %cst_47 {dimension_numbers = #tpu.dot_dimension_numbers<[1], [0], [0], [1], [0, 0, 1, 1], [], []>} : vector<32x8xbf16>, vector<8x256xbf16>, vector<32x256xf32> -> vector<32x256xf32>
    %c2_48 = arith.constant 2 : index
    %c0_49 = arith.constant 0 : index
    %c0_50 = arith.constant 0 : index
    %65 = vector.load %arg6[%c2_48, %c0_49, %c0_50] : memref<4x72x1xf32, #tpu.memory_space<vmem>>, vector<1x32x1xf32>
    %66 = vector.shape_cast %65 : vector<1x32x1xf32> to vector<32x1xf32>
    %67 = vector.broadcast %66 : vector<32x1xf32> to vector<32x256xf32>
    %68 = arith.addf %64, %67 : vector<32x256xf32>
    %cst_51 = arith.constant 0.000000e+00 : f32
    %69 = vector.broadcast %cst_51 : f32 to vector<32x256xf32>
    %70 = arith.maximumf %68, %69 : vector<32x256xf32>
    %c2_52 = arith.constant 2 : index
    %c0_53 = arith.constant 0 : index
    %c0_54 = arith.constant 0 : index
    %c0_55 = arith.constant 0 : index
    %71 = vector.load %arg4[%c2_52, %c0_53, %c0_54, %c0_55] : memref<4x1x32x32xbf16, #tpu.memory_space<vmem>>, vector<1x1x32x32xbf16>
    %72 = vector.shape_cast %71 : vector<1x1x32x32xbf16> to vector<32x32xbf16>
    %73 = arith.truncf %70 : vector<32x256xf32> to vector<32x256xbf16>
    %cst_56 = arith.constant dense<0.000000e+00> : vector<32x256xf32>
    %74 = tpu.matmul %72, %73, %cst_56 {dimension_numbers = #tpu.dot_dimension_numbers<[1], [0], [0], [1], [0, 0, 1, 1], [], []>} : vector<32x32xbf16>, vector<32x256xbf16>, vector<32x256xf32> -> vector<32x256xf32>
    %c2_57 = arith.constant 2 : index
    %c32_58 = arith.constant 32 : index
    %c0_59 = arith.constant 0 : index
    %75 = vector.load %arg6[%c2_57, %c32_58, %c0_59] : memref<4x72x1xf32, #tpu.memory_space<vmem>>, vector<1x32x1xf32>
    %76 = vector.shape_cast %75 : vector<1x32x1xf32> to vector<32x1xf32>
    %77 = vector.broadcast %76 : vector<32x1xf32> to vector<32x256xf32>
    %78 = arith.addf %74, %77 : vector<32x256xf32>
    %cst_60 = arith.constant 0.000000e+00 : f32
    %79 = vector.broadcast %cst_60 : f32 to vector<32x256xf32>
    %80 = arith.maximumf %78, %79 : vector<32x256xf32>
    %c2_61 = arith.constant 2 : index
    %c0_62 = arith.constant 0 : index
    %c0_63 = arith.constant 0 : index
    %81 = vector.load %arg5[%c2_61, %c0_62, %c0_63] : memref<4x8x32xbf16, #tpu.memory_space<vmem>>, vector<1x8x32xbf16>
    %82 = vector.shape_cast %81 : vector<1x8x32xbf16> to vector<8x32xbf16>
    %83 = arith.truncf %80 : vector<32x256xf32> to vector<32x256xbf16>
    %cst_64 = arith.constant dense<0.000000e+00> : vector<8x256xf32>
    %84 = tpu.matmul %82, %83, %cst_64 {dimension_numbers = #tpu.dot_dimension_numbers<[1], [0], [0], [1], [0, 0, 1, 1], [], []>} : vector<8x32xbf16>, vector<32x256xbf16>, vector<8x256xf32> -> vector<8x256xf32>
    %c2_65 = arith.constant 2 : index
    %c64_66 = arith.constant 64 : index
    %c0_67 = arith.constant 0 : index
    %85 = vector.load %arg6[%c2_65, %c64_66, %c0_67] : memref<4x72x1xf32, #tpu.memory_space<vmem>>, vector<1x8x1xf32>
    %86 = vector.shape_cast %85 : vector<1x8x1xf32> to vector<8x1xf32>
    %87 = vector.broadcast %86 : vector<8x1xf32> to vector<8x256xf32>
    %88 = arith.addf %84, %87 : vector<8x256xf32>
    %89 = arith.addf %31, %88 : vector<8x256xf32>
    %c3 = arith.constant 3 : index
    %c0_68 = arith.constant 0 : index
    %c0_69 = arith.constant 0 : index
    %90 = vector.load %arg3[%c3, %c0_68, %c0_69] : memref<4x32x8xbf16, #tpu.memory_space<vmem>>, vector<1x32x8xbf16>
    %91 = vector.shape_cast %90 : vector<1x32x8xbf16> to vector<32x8xbf16>
    %92 = arith.truncf %89 : vector<8x256xf32> to vector<8x256xbf16>
    %cst_70 = arith.constant dense<0.000000e+00> : vector<32x256xf32>
    %93 = tpu.matmul %91, %92, %cst_70 {dimension_numbers = #tpu.dot_dimension_numbers<[1], [0], [0], [1], [0, 0, 1, 1], [], []>} : vector<32x8xbf16>, vector<8x256xbf16>, vector<32x256xf32> -> vector<32x256xf32>
    %c3_71 = arith.constant 3 : index
    %c0_72 = arith.constant 0 : index
    %c0_73 = arith.constant 0 : index
    %94 = vector.load %arg6[%c3_71, %c0_72, %c0_73] : memref<4x72x1xf32, #tpu.memory_space<vmem>>, vector<1x32x1xf32>
    %95 = vector.shape_cast %94 : vector<1x32x1xf32> to vector<32x1xf32>
    %96 = vector.broadcast %95 : vector<32x1xf32> to vector<32x256xf32>
    %97 = arith.addf %93, %96 : vector<32x256xf32>
    %cst_74 = arith.constant 0.000000e+00 : f32
    %98 = vector.broadcast %cst_74 : f32 to vector<32x256xf32>
    %99 = arith.maximumf %97, %98 : vector<32x256xf32>
    %c3_75 = arith.constant 3 : index
    %c0_76 = arith.constant 0 : index
    %c0_77 = arith.constant 0 : index
    %c0_78 = arith.constant 0 : index
    %100 = vector.load %arg4[%c3_75, %c0_76, %c0_77, %c0_78] : memref<4x1x32x32xbf16, #tpu.memory_space<vmem>>, vector<1x1x32x32xbf16>
    %101 = vector.shape_cast %100 : vector<1x1x32x32xbf16> to vector<32x32xbf16>
    %102 = arith.truncf %99 : vector<32x256xf32> to vector<32x256xbf16>
    %cst_79 = arith.constant dense<0.000000e+00> : vector<32x256xf32>
    %103 = tpu.matmul %101, %102, %cst_79 {dimension_numbers = #tpu.dot_dimension_numbers<[1], [0], [0], [1], [0, 0, 1, 1], [], []>} : vector<32x32xbf16>, vector<32x256xbf16>, vector<32x256xf32> -> vector<32x256xf32>
    %c3_80 = arith.constant 3 : index
    %c32_81 = arith.constant 32 : index
    %c0_82 = arith.constant 0 : index
    %104 = vector.load %arg6[%c3_80, %c32_81, %c0_82] : memref<4x72x1xf32, #tpu.memory_space<vmem>>, vector<1x32x1xf32>
    %105 = vector.shape_cast %104 : vector<1x32x1xf32> to vector<32x1xf32>
    %106 = vector.broadcast %105 : vector<32x1xf32> to vector<32x256xf32>
    %107 = arith.addf %103, %106 : vector<32x256xf32>
    %cst_83 = arith.constant 0.000000e+00 : f32
    %108 = vector.broadcast %cst_83 : f32 to vector<32x256xf32>
    %109 = arith.maximumf %107, %108 : vector<32x256xf32>
    %c3_84 = arith.constant 3 : index
    %c0_85 = arith.constant 0 : index
    %c0_86 = arith.constant 0 : index
    %110 = vector.load %arg5[%c3_84, %c0_85, %c0_86] : memref<4x8x32xbf16, #tpu.memory_space<vmem>>, vector<1x8x32xbf16>
    %111 = vector.shape_cast %110 : vector<1x8x32xbf16> to vector<8x32xbf16>
    %112 = arith.truncf %109 : vector<32x256xf32> to vector<32x256xbf16>
    %cst_87 = arith.constant dense<0.000000e+00> : vector<8x256xf32>
    %113 = tpu.matmul %111, %112, %cst_87 {dimension_numbers = #tpu.dot_dimension_numbers<[1], [0], [0], [1], [0, 0, 1, 1], [], []>} : vector<8x32xbf16>, vector<32x256xbf16>, vector<8x256xf32> -> vector<8x256xf32>
    %c3_88 = arith.constant 3 : index
    %c64_89 = arith.constant 64 : index
    %c0_90 = arith.constant 0 : index
    %114 = vector.load %arg6[%c3_88, %c64_89, %c0_90] : memref<4x72x1xf32, #tpu.memory_space<vmem>>, vector<1x8x1xf32>
    %115 = vector.shape_cast %114 : vector<1x8x1xf32> to vector<8x1xf32>
    %116 = vector.broadcast %115 : vector<8x1xf32> to vector<8x256xf32>
    %117 = arith.addf %113, %116 : vector<8x256xf32>
    %118 = arith.addf %60, %117 : vector<8x256xf32>
    %119 = tpu.concatenate %118, %89 in 0 : vector<8x256xf32>, vector<8x256xf32> -> vector<16x256xf32>
    %c0_91 = arith.constant 0 : index
    %c0_92 = arith.constant 0 : index
    %120 = vector.load %arg7[%c0_91, %c0_92] : memref<16x1xf32, #tpu.memory_space<vmem>>, vector<16x1xf32>
    %121 = vector.broadcast %120 : vector<16x1xf32> to vector<16x256xf32>
    %122 = arith.mulf %119, %121 : vector<16x256xf32>
    %123 = math.absf %122 : vector<16x256xf32>
    %cst_93 = arith.constant 0.000000e+00 : f32
    %124 = vector.broadcast %cst_93 : f32 to vector<16x256xf32>
    %125 = arith.subf %124, %123 : vector<16x256xf32>
    %cst_94 = arith.constant 0.000000e+00 : f32
    %126 = vector.broadcast %cst_94 : f32 to vector<16x256xf32>
    %127 = arith.subf %126, %123 : vector<16x256xf32>
    %128 = math.exp %127 : vector<16x256xf32>
    %cst_95 = arith.constant 1.000000e+00 : f32
    %129 = vector.broadcast %cst_95 : f32 to vector<16x256xf32>
    %130 = arith.addf %129, %128 : vector<16x256xf32>
    %131 = math.log %130 : vector<16x256xf32>
    %cst_96 = arith.constant 2.000000e+00 : f32
    %132 = vector.broadcast %cst_96 : f32 to vector<16x256xf32>
    %133 = arith.mulf %132, %131 : vector<16x256xf32>
    %134 = arith.subf %125, %133 : vector<16x256xf32>
    %cst_97 = arith.constant dense<0.000000e+00> : vector<256xf32>
    %135 = vector.multi_reduction <add>, %134, %cst_97 [0] : vector<16x256xf32> to vector<256xf32>
    %136 = vector.shape_cast %135 : vector<256xf32> to vector<1x256xf32>
    %c0_98 = arith.constant 0 : index
    %c0_99 = arith.constant 0 : index
    %137 = memref.load %arg1[%c0_98, %c0_99] : memref<1x1xf32, #tpu.memory_space<smem>>
    %138 = vector.broadcast %137 : f32 to vector<1x256xf32>
    %139 = arith.addf %136, %138 : vector<1x256xf32>
    %c0_100 = arith.constant 0 : index
    %c0_101 = arith.constant 0 : index
    %140 = vector.load %arg8[%c0_100, %c0_101] : memref<1x256xf32, #tpu.memory_space<vmem>>, vector<1x256xf32>
    tpu.vector_store %arg8[%c0_100, %c0_101], %139 {strides = array<i32>} : memref<1x256xf32, #tpu.memory_space<vmem>>, vector<1x256xf32>,
    return
  }
  func.func @transform_0(%arg0: i32) -> (i32, i32) {
    %c0_i32 = arith.constant 0 : i32
    %c0_i32_0 = arith.constant 0 : i32
    %c0_i32_1 = arith.constant 0 : i32
    return %c0_i32, %c0_i32_0 : i32, i32
  }
  func.func @transform_1(%arg0: i32) -> (i32, i32) {
    %c0_i32 = arith.constant 0 : i32
    %c0_i32_0 = arith.constant 0 : i32
    return %c0_i32, %arg0 : i32, i32
  }
  func.func @transform_2(%arg0: i32) -> (i32, i32, i32) {
    %c0_i32 = arith.constant 0 : i32
    %c0_i32_0 = arith.constant 0 : i32
    %c0_i32_1 = arith.constant 0 : i32
    %c0_i32_2 = arith.constant 0 : i32
    return %c0_i32, %c0_i32_0, %c0_i32_1 : i32, i32, i32
  }
  func.func @transform_3(%arg0: i32) -> (i32, i32, i32, i32) {
    %c0_i32 = arith.constant 0 : i32
    %c0_i32_0 = arith.constant 0 : i32
    %c0_i32_1 = arith.constant 0 : i32
    %c0_i32_2 = arith.constant 0 : i32
    %c0_i32_3 = arith.constant 0 : i32
    return %c0_i32, %c0_i32_0, %c0_i32_1, %c0_i32_2 : i32, i32, i32, i32
  }
  func.func @transform_4(%arg0: i32) -> (i32, i32, i32) {
    %c0_i32 = arith.constant 0 : i32
    %c0_i32_0 = arith.constant 0 : i32
    %c0_i32_1 = arith.constant 0 : i32
    %c0_i32_2 = arith.constant 0 : i32
    return %c0_i32, %c0_i32_0, %c0_i32_1 : i32, i32, i32
  }
  func.func @transform_5(%arg0: i32) -> (i32, i32, i32) {
    %c0_i32 = arith.constant 0 : i32
    %c0_i32_0 = arith.constant 0 : i32
    %c0_i32_1 = arith.constant 0 : i32
    %c0_i32_2 = arith.constant 0 : i32
    return %c0_i32, %c0_i32_0, %c0_i32_1 : i32, i32, i32
  }
  func.func @transform_6(%arg0: i32) -> (i32, i32) {
    %c0_i32 = arith.constant 0 : i32
    %c0_i32_0 = arith.constant 0 : i32
    %c0_i32_1 = arith.constant 0 : i32
    return %c0_i32, %c0_i32_0 : i32, i32
  }
  func.func @transform_7(%arg0: i32) -> (i32, i32) {
    %c0_i32 = arith.constant 0 : i32
    %c0_i32_0 = arith.constant 0 : i32
    return %c0_i32, %arg0 : i32, i32
  }
}

</mosaic_0001>

<bundles_post_ra>
// kernel: tpu_custom_call.1
= control target key start
LH: loop header
LB: loop body
LE: loop exit
PB: predicated region body
PF: predicated region fallthrough
CT: control target
= control target key end

     0   :  { %v1511_v0 = vld [vmem:[#allocation3 + $0x8] sm:$0xff]  ;;  %vm118_vm0 = vcmask 1043456   ;;  %v1468_v4 = vmov 0   ;;  %vm111_vm1 = vcmask 64512   ;;  %s1796_s0 = inlined_call_operand.<no memory space> [shape: f32[1,1], index: 0, kind: input, shape index: {}]   ;;  %s1797_s1 = inlined_call_operand.vmem [shape: f32[16,8], index: 1, kind: input, shape index: {}]   ;;  %s1798_s2 = inlined_call_operand.vmem [shape: bf16[4,32,8], index: 2, kind: input, shape index: {}]   ;;  %s1799_s3 = inlined_call_operand.vmem [shape: bf16[4,1,32,32], index: 3, kind: input, shape index: {}]   ;;  %s1800_s4 = inlined_call_operand.vmem [shape: bf16[4,8,32], index: 4, kind: input, shape index: {}]   ;;  %s1801_s5 = inlined_call_operand.vmem [shape: f32[4,72,1], index: 5, kind: input, shape index: {}]   ;;  %s1802_s6 = inlined_call_operand.vmem [shape: f32[16,1], index: 6, kind: input, shape index: {}]   ;;  %s1803_s7 = inlined_call_operand.hbm [shape: f32[1,256], index: 7, kind: output, shape index: {}]  }
   0x1   :  { %v1516_v1 = vld [vmem:[%s1797_s1] sm:$0xff]  ;;  %v76_v2 = vpack.c.bf16 %v1511_v0, %v1511_v0  ;;  %157 = vmatprep.mubr.bf16.mxu0 %v1468_v4  ;;  %1410 = vset.pattern.permute.xlu0 %v1468_v4  ;;  %v79_v8 = vld [vmem:[%s1801_s5 + $0x10] sm:$0xff]  ;;  %v78_v9 = vld [vmem:[%s1801_s5 + $0x8] sm:$0xff] }
   0x2   :  { %v75_v3 = vpack.c.bf16 %v1516_v1, %v1516_v1  ;;  %v77_v5 = vld [vmem:[%s1801_s5] sm:$0xff]  ;;  %1411 = vset.pattern.permute.xlu1 %v1468_v4  ;;  %267 = vmatprep.mubr.bf16.mxu1 %v1468_v4  ;;  %v80_v10 = vld [vmem:[%s1801_s5 + $0x18] sm:$0xff]  ;;  %v195_v12 = vld [vmem:[%s1801_s5 + $0x28] sm:$0xff] }
   0x3   :  { %1315 = vmatprep.subr.msk.bf16.mxu0 %vm118_vm0, %v76_v2  ;;  %v1412_v7 = vld [vmem:[%s1798_s2] sm:$0xff]   ;;  %83 = vperm.xlu0 %1410, %v77_v5   ;;  %v1413_v13 = vld [vmem:[%s1798_s2 + $0x8] sm:$0xff]   ;;  %v196_v14 = vld [vmem:[%s1801_s5 + $0x30] sm:$0xff] }
   0x4   :  { %v120_v6 = vsel %vm118_vm0, %v75_v3, 0  ;;  %93 = vperm.xlu1 %1411, %v79_v8   ;;  %v194_v11 = vld [vmem:[%s1801_s5 + $0x20] sm:$0xff]  ;;  %v197_v15 = vld [vmem:[%s1801_s5 + $0x38] sm:$0xff]  ;;  %v1327_v17 = vld [vmem:[%s1801_s5 + $0x48] sm:$0xff] }
   0x5   :  { %126 = vmatpush1.bf16.msra.mxu0 %v120_v6  ;;  %v301_v16 = vld [vmem:[%s1801_s5 + $0x40] sm:$0xff]  ;;  %v1328_v18 = vld [vmem:[%s1801_s5 + $0x50] sm:$0xff]  ;;  %v1329_v19 = vld [vmem:[%s1801_s5 + $0x58] sm:$0xff] }
   0x6   :  { %v1330_v20 = vld [vmem:[%s1801_s5 + $0x60] sm:$0xff] }
   0x7   :  { %88 = vperm.xlu0 %1410, %v78_v9  }
   0x8   :  { %1316 = vmatmul.mubr.msk.bf16.vlgmr.msra.gmra.mrb[0].mxu0 %vm111_vm1, %v1412_v7  ;;  %98 = vperm.xlu1 %1411, %v80_v10  }
   0x9   :  { %167 = vmatprep.mubr.bf16.mxu0 %v1468_v4 }
   0xb   :  { %200 = vperm.xlu0 %1410, %v194_v11  }
   0xc   :  { %205 = vperm.xlu1 %1411, %v195_v12  }
   0xf   :  { %210 = vperm.xlu0 %1410, %v196_v14  }
  0x10   :  { %1317 = vmatmul.mubr.msk.bf16.gmra.mrb[4].mxu0 %vm111_vm1, %v1413_v13  ;;  %215 = vperm.xlu1 %1411, %v197_v15  }
  0x11   :  { %342 = vmatprep.mubr.bf16.mxu0 %v1468_v4 }
  0x13   :  { %304 = vperm.xlu0 %1410, %v301_v16  }
  0x14   :  { %367 = vperm.xlu1 %1411, %v1327_v17  }
  0x17   :  { %372 = vperm.xlu0 %1410, %v1328_v18  }
  0x18   :  { %377 = vperm.xlu1 %1411, %v1329_v19  }
  0x19   :  { %13 = vsyncpa [#allocation5], 0  ;;  %v1340_v21 = vld [vmem:[%s1801_s5 + $0x68] sm:$0xff]  ;;  %v1341_v22 = vld [vmem:[%s1801_s5 + $0x70] sm:$0xff]  ;;  %vm228_vm2 = vcmask 261120   ;;  %s1470_s22 = smov [#allocation4]  }
  0x1a   :  { %v1342_v23 = vld [vmem:[%s1801_s5 + $0x78] sm:$0xff]  ;;  %v1343_v24 = vld [vmem:[%s1801_s5 + $0x80] sm:$0xff]  ;;  %v1349_v25 = vld [vmem:[%s1801_s5 + $0x88] sm:$0xff]  ;;  %s1301_s23 = sshll.u32 %s1470_s22, 4  ;;  %s1302_s23 = int_to_ptr.vmem [resolvable:$true] %s1301_s23 }
  0x1b   :  { %382 = vperm.xlu0 %1410, %v1330_v20   ;;  %v1355_v26 = vld [vmem:[%s1801_s5 + $0x90] sm:$0xff]  ;;  %v1356_v27 = vld [vmem:[%s1801_s5 + $0x98] sm:$0xff]  ;;  %v1357_v28 = vld [vmem:[%s1801_s5 + $0xa0] sm:$0xff]  ;;  %s1444_s24 = scalar_lea.vmem %s1302_s23, 32  ;;  %p1449_p1 = scmp.lt.s32.totalorder %s1302_s23, %s1302_s23 }
  0x1c   :  { %483 = vperm.xlu1 %1411, %v1340_v21   ;;  %v1358_v29 = vld [vmem:[%s1801_s5 + $0xa8] sm:$0xff]  ;;  %v1368_v30 = vld [vmem:[%s1801_s5 + $0xb0] sm:$0xff]  ;;  %v1369_v31 = vld [vmem:[%s1801_s5 + $0xb8] sm:$0xff]  ;;  %p1445_p0 = scmp.ne.s32.totalorder %s1302_s23, %s1444_s24  ;;  %p1450_p2 = scmp.lt.s32.totalorder %s1444_s24, %s1444_s24 }
  0x1d   :  { %v1370_v32 = vld [vmem:[%s1801_s5 + $0xc0] sm:$0xff]  ;;  %v1371_v33 = vld [vmem:[%s1801_s5 + $0xc8] sm:$0xff]  ;;  %v1377_v34 = vld [vmem:[%s1801_s5 + $0xd0] sm:$0xff] }
  0x1e   :  { %v1383_v35 = vld [vmem:[%s1801_s5 + $0xd8] sm:$0xff]  ;;  %v1384_v36 = vld [vmem:[%s1801_s5 + $0xe0] sm:$0xff]  ;;  %v1385_v37 = vld [vmem:[%s1801_s5 + $0xe8] sm:$0xff]  ;;  %p1451_p3 = por %p1450_p2, %p1449_p1 }
  0x1f   :  { %488 = vperm.xlu0 %1410, %v1341_v22   ;;  %v1386_v38 = vld [vmem:[%s1801_s5 + $0xf0] sm:$0xff]  ;;  %v1396_v39 = vld [vmem:[%s1801_s5 + $0xf8] sm:$0xff]  ;;  %v1397_v40 = vld [vmem:[%s1801_s5 + $0x100] sm:$0xff] }
  0x20   :  { %493 = vperm.xlu1 %1411, %v1342_v23   ;;  %v1398_v41 = vld [vmem:[%s1801_s5 + $0x108] sm:$0xff]  ;;  %v1399_v42 = vld [vmem:[%s1801_s5 + $0x110] sm:$0xff]  ;;  %v1405_v43 = vld [vmem:[%s1801_s5 + $0x118] sm:$0xff]  ;;  %p1452_p4 = pnand %p1451_p3, %p1445_p0 }
  0x21   :  { %v1202_v44 = vld [vmem:[%s1802_s6] sm:$0xff]  ;;  %v1203_v45 = vld [vmem:[%s1802_s6 + $0x8] sm:$0xff] }
  0x22   :  { %v1414_v17 = vld [vmem:[%s1799_s3] sm:$0xff]   ;;  %v1415_v18 = vld [vmem:[%s1799_s3 + $0x8] sm:$0xff]  }
  0x23   :  { %498 = vperm.xlu0 %1410, %v1343_v24   ;;  %v49_v19 = vld [vmem:[%s1797_s1 + $0x8] sm:$0xff] }
  0x24   :  { %587 = vperm.xlu1 %1411, %v1349_v25  }
  0x27   :  { %650 = vperm.xlu0 %1410, %v1355_v26  }
  0x28   :  { %655 = vperm.xlu1 %1411, %v1356_v27  }
  0x2b   :  { %660 = vperm.xlu0 %1410, %v1357_v28  }
  0x2c   :  { %665 = vperm.xlu1 %1411, %v1358_v29  }
  0x2f   :  { %766 = vperm.xlu0 %1410, %v1368_v30  }
  0x30   :  { %771 = vperm.xlu1 %1411, %v1369_v31  }
  0x33   :  { %776 = vperm.xlu0 %1410, %v1370_v32  }
  0x34   :  { %781 = vperm.xlu1 %1411, %v1371_v33  }
  0x37   :  { %870 = vperm.xlu0 %1410, %v1377_v34  }
  0x38   :  { %933 = vperm.xlu1 %1411, %v1383_v35  }
  0x3b   :  { %938 = vperm.xlu0 %1410, %v1384_v36  }
  0x3c   :  { %943 = vperm.xlu1 %1411, %v1385_v37  }
  0x3f   :  { %948 = vperm.xlu0 %1410, %v1386_v38  }
  0x40   :  { %1049 = vperm.xlu1 %1411, %v1396_v39  }
  0x43   :  { %1054 = vperm.xlu0 %1410, %v1397_v40  }
  0x44   :  { %1059 = vperm.xlu1 %1411, %v1398_v41  }
  0x47   :  { %1064 = vperm.xlu0 %1410, %v1399_v42  }
  0x48   :  { %1153 = vperm.xlu1 %1411, %v1405_v43  }
  0x4b   :  { %1206 = vperm.xlu0 %1410, %v1202_v44  }
  0x4c   :  { %1211 = vperm.xlu1 %1411, %v1203_v45  }
  0x82   :  { %v84_v46 = vpop.permute.xlu0 %83 }
  0x83   :  { %v94_v55 = vpop.permute.xlu1 %93 }
  0x86   :  { %v89_v50 = vpop.permute.xlu0 %88 }
  0x87   :  { %v99_v5 = vpop.permute.xlu1 %98 }
  0x8a   :  { %v201_v20 = vpop.permute.xlu0 %200 }
  0x8b   :  { %v206_v24 = vpop.permute.xlu1 %205 }
  0x8e   :  { %v211_v35 = vpop.permute.xlu0 %210 }
  0x8f   :  { %v216_v40 = vpop.permute.xlu1 %215 }
  0xdb   :  { %v159_v47 = vpop.f32.mrb[0].mxu0 }
  0xdc   :  { %v160_v48 = vadd.f32 %v159_v47, %v84_v46  ;;  %v161_v49 = vpop.f32.mrb[1].mxu0 }
  0xdd   :  { %v162_v51 = vadd.f32 %v161_v49, %v84_v46  ;;  %v163_v52 = vpop.f32.mrb[2].mxu0 }
  0xde   :  { %v164_v53 = vadd.f32 %v163_v52, %v89_v50  ;;  %v165_v54 = vpop.f32.mrb[3].mxu0  ;;  %v178_v57 = vmax.f32 %v160_v48, 0.0  ;;  %v296_v52 = vld [vmem:[%s1800_s4] sm:$0xf] }
  0xdf   :  { %v166_v56 = vadd.f32 %v165_v54, %v89_v50  ;;  %v179_v59 = vmax.f32 %v162_v51, 0.0 }
  0xe0   :  { %v180_v58 = vmax.f32 %v164_v53, 0.0  ;;  %v305_v53 = vpop.permute.xlu0 %304 }
  0xe1   :  { %v181_v60 = vmax.f32 %v166_v56, 0.0  ;;  %v70_v56 = vld [vmem:[#allocation3 + $0x18] sm:$0xff] }
  0xe2   :  { %v190_v61 = vpack.c.bf16 %v180_v58, %v178_v57 }
  0xe3   :  { %v169_v62 = vpop.f32.mrb[4].mxu0  ;;  %v191_v63 = vpack.c.bf16 %v181_v60, %v179_v59 }
  0xe4   :  { %v170_v2 = vadd.f32 %v169_v62, %v94_v55  ;;  %v171_v3 = vpop.f32.mrb[5].mxu0 }
  0xe5   :  { %v172_v6 = vadd.f32 %v171_v3, %v94_v55  ;;  %v173_v7 = vpop.f32.mrb[6].mxu0  ;;  %235 = vmatprep.subr.bf16.mxu1 %v191_v63 }
  0xe6   :  { %v174_v8 = vadd.f32 %v173_v7, %v99_v5  ;;  %v175_v9 = vpop.f32.mrb[7].mxu0  ;;  %236 = vmatpush1.bf16.msra.mxu1 %v190_v61  ;;  %v182_v11 = vmax.f32 %v170_v2, 0.0  ;;  %v368_v7 = vpop.permute.xlu1 %367 }
  0xe7   :  { %v176_v10 = vadd.f32 %v175_v9, %v99_v5  ;;  %v183_v13 = vmax.f32 %v172_v6, 0.0  ;;  %v1416_v5 = vld [vmem:[%s1798_s2 + $0x10] sm:$0xff]   ;;  %v1417_v6 = vld [vmem:[%s1798_s2 + $0x18] sm:$0xff]  }
  0xe8   :  { %v184_v12 = vmax.f32 %v174_v8, 0.0 }
  0xe9   :  { %v185_v14 = vmax.f32 %v176_v10, 0.0 }
  0xea   :  { %v192_v15 = vpack.c.bf16 %v184_v12, %v182_v11  ;;  %v373_v11 = vpop.permute.xlu0 %372 }
  0xeb   :  { %v193_v16 = vpack.c.bf16 %v185_v14, %v183_v13 }
  0xed   :  { %237 = vmatprep.subr.bf16.mxu1 %v193_v16 }
  0xee   :  { %238 = vmatpush1.bf16.msra.mxu1 %v192_v15 }
  0xf1   :  { %1320 = vmatmul.mubr.msk.bf16.vlgmr.msra.gmra.mrb[0].mxu1 %vm228_vm2, %v1414_v17 }
  0xf2   :  { %277 = vmatprep.mubr.bf16.mxu1 %v1468_v4 }
  0xf9   :  { %1321 = vmatmul.mubr.msk.bf16.gmra.mrb[4].mxu1 %vm228_vm2, %v1415_v18 }
  0xfa   :  { %439 = vmatprep.mubr.bf16.mxu1 %v1468_v4 }
 0x1c4   :  { %v269_v21 = vpop.f32.mrb[0].mxu1 }
 0x1c5   :  { %v270_v22 = vadd.f32 %v269_v21, %v201_v20  ;;  %v271_v23 = vpop.f32.mrb[1].mxu1 }
 0x1c6   :  { %v272_v25 = vadd.f32 %v271_v23, %v201_v20  ;;  %v273_v26 = vpop.f32.mrb[2].mxu1 }
 0x1c7   :  { %v274_v27 = vadd.f32 %v273_v26, %v206_v24  ;;  %v275_v28 = vpop.f32.mrb[3].mxu1  ;;  %v288_v30 = vmax.f32 %v270_v22, 0.0  ;;  %v378_v22 = vpop.permute.xlu1 %377 }
 0x1c8   :  { %v276_v29 = vadd.f32 %v275_v28, %v206_v24  ;;  %v289_v32 = vmax.f32 %v272_v25, 0.0 }
 0x1c9   :  { %v290_v31 = vmax.f32 %v274_v27, 0.0  ;;  %v383_v27 = vpop.permute.xlu0 %382 }
 0x1ca   :  { %v291_v33 = vmax.f32 %v276_v29, 0.0 }
 0x1cb   :  { %v297_v34 = vpack.c.bf16 %v290_v31, %v288_v30 }
 0x1cc   :  { %v298_v36 = vpack.c.bf16 %v291_v33, %v289_v32  ;;  %v279_v37 = vpop.f32.mrb[4].mxu1 }
 0x1cd   :  { %v280_v38 = vadd.f32 %v279_v37, %v211_v35  ;;  %v281_v39 = vpop.f32.mrb[5].mxu1 }
 0x1ce   :  { %v282_v41 = vadd.f32 %v281_v39, %v211_v35  ;;  %v283_v42 = vpop.f32.mrb[6].mxu1  ;;  %310 = vmatprep.subr.bf16.mxu0 %v298_v36  ;;  %v1418_v39 = vld [vmem:[%s1799_s3 + $0x10] sm:$0xff]  }
 0x1cf   :  { %v284_v43 = vadd.f32 %v283_v42, %v216_v40  ;;  %v285_v44 = vpop.f32.mrb[7].mxu1  ;;  %311 = vmatpush1.bf16.msra.mxu0 %v297_v34  ;;  %v292_v46 = vmax.f32 %v280_v38, 0.0 }
 0x1d0   :  { %v286_v45 = vadd.f32 %v285_v44, %v216_v40  ;;  %v293_v48 = vmax.f32 %v282_v41, 0.0  ;;  %v1419_v40 = vld [vmem:[%s1799_s3 + $0x18] sm:$0xff]   ;;  %v484_v41 = vpop.permute.xlu1 %483 }
 0x1d1   :  { %v294_v47 = vmax.f32 %v284_v43, 0.0 }
 0x1d2   :  { %v295_v49 = vmax.f32 %v286_v45, 0.0  ;;  %v489_v45 = vpop.permute.xlu0 %488 }
 0x1d3   :  { %v299_v50 = vpack.c.bf16 %v294_v47, %v292_v46 }
 0x1d4   :  { %v300_v51 = vpack.c.bf16 %v295_v49, %v293_v48 }
 0x1d6   :  { %312 = vmatprep.subr.bf16.mxu0 %v300_v51 }
 0x1d7   :  { %313 = vmatpush1.bf16.msra.mxu0 %v299_v50 }
 0x1da   :  { %1322 = vmatmul.mubr.msk.bf16.vlgmr.msra.gmra.mrb[8].mxu0 %vm228_vm2, %v296_v52 }
 0x1db   :  { %549 = vmatprep.mubr.bf16.mxu0 %v1468_v4 }
 0x2ad   :  { %v344_v54 = vpop.f32.mrb[8].mxu0 }
 0x2ae   :  { %v345_v55 = vadd.f32 %v344_v54, %v305_v53  ;;  %v346_v57 = vpop.f32.mrb[9].mxu0 }
 0x2af   :  { %v347_v58 = vadd.f32 %v346_v57, %v305_v53  ;;  %v348_v59 = vpop.f32.mrb[10].mxu0 }
 0x2b0   :  { %v1670_v60 = vadd.f32 %v345_v55, %v49_v19  ;;  %v349_v61 = vpop.f32.mrb[11].mxu0 }
 0x2b1   :  { %v1672_v62 = vadd.f32 %v347_v58, %v70_v56  ;;  %v494_v56 = vpop.permute.xlu1 %493 }
 0x2b2   :  { %v358_v63 = vpack.c.bf16 %v1670_v60, %v1670_v60 }
 0x2b3   :  { %v359_v2 = vpack.c.bf16 %v1672_v62, %v1672_v62 }
 0x2b4   :  { %v402_v3 = vsel %vm118_vm0, %v358_v63, 0  ;;  %v499_v63 = vpop.permute.xlu0 %498 }
 0x2b5   :  { %1333 = vmatprep.subr.msk.bf16.mxu1 %vm118_vm0, %v359_v2 }
 0x2b6   :  { %408 = vmatpush1.bf16.msra.mxu1 %v402_v3 }
 0x2b9   :  { %1334 = vmatmul.mubr.msk.bf16.vlgmr.msra.gmra.mrb[8].mxu1 %vm111_vm1, %v1416_v5 }
 0x2ba   :  { %449 = vmatprep.mubr.bf16.mxu1 %v1468_v4 }
 0x2c1   :  { %1335 = vmatmul.mubr.msk.bf16.gmra.mrb[12].mxu1 %vm111_vm1, %v1417_v6 }
 0x2c2   :  { %625 = vmatprep.mubr.bf16.mxu1 %v1468_v4 }
 0x38c   :  { %v441_v8 = vpop.f32.mrb[8].mxu1 }
 0x38d   :  { %v442_v9 = vadd.f32 %v441_v8, %v368_v7  ;;  %v443_v10 = vpop.f32.mrb[9].mxu1 }
 0x38e   :  { %v444_v12 = vadd.f32 %v443_v10, %v368_v7  ;;  %v445_v13 = vpop.f32.mrb[10].mxu1 }
 0x38f   :  { %v446_v14 = vadd.f32 %v445_v13, %v373_v11  ;;  %v447_v15 = vpop.f32.mrb[11].mxu1  ;;  %v460_v17 = vmax.f32 %v442_v9, 0.0 }
 0x390   :  { %v448_v16 = vadd.f32 %v447_v15, %v373_v11  ;;  %v461_v19 = vmax.f32 %v444_v12, 0.0  ;;  %v588_v15 = vpop.permute.xlu1 %587 }
 0x391   :  { %v462_v18 = vmax.f32 %v446_v14, 0.0  ;;  %v1348_v14 = vld [vmem:[%s1800_s4 + $0x4] sm:$0xf] }
 0x392   :  { %v463_v20 = vmax.f32 %v448_v16, 0.0 }
 0x393   :  { %v473_v21 = vpack.c.bf16 %v462_v18, %v460_v17 }
 0x394   :  { %v474_v23 = vpack.c.bf16 %v463_v20, %v461_v19  ;;  %v451_v24 = vpop.f32.mrb[12].mxu1 }
 0x395   :  { %v452_v25 = vadd.f32 %v451_v24, %v378_v22  ;;  %v453_v26 = vpop.f32.mrb[13].mxu1 }
 0x396   :  { %v454_v28 = vadd.f32 %v453_v26, %v378_v22  ;;  %v455_v29 = vpop.f32.mrb[14].mxu1  ;;  %517 = vmatprep.subr.bf16.mxu0 %v474_v23 }
 0x397   :  { %v456_v30 = vadd.f32 %v455_v29, %v383_v27  ;;  %v457_v31 = vpop.f32.mrb[15].mxu1  ;;  %518 = vmatpush1.bf16.msra.mxu0 %v473_v21  ;;  %v464_v33 = vmax.f32 %v452_v25, 0.0 }
 0x398   :  { %v458_v32 = vadd.f32 %v457_v31, %v383_v27  ;;  %v465_v35 = vmax.f32 %v454_v28, 0.0  ;;  %v1420_v27 = vld [vmem:[%s1798_s2 + $0x20] sm:$0xff]   ;;  %v656_v31 = vpop.permute.xlu1 %655 }
 0x399   :  { %v466_v34 = vmax.f32 %v456_v30, 0.0 }
 0x39a   :  { %v467_v36 = vmax.f32 %v458_v32, 0.0 }
 0x39b   :  { %v475_v37 = vpack.c.bf16 %v466_v34, %v464_v33 }
 0x39c   :  { %v476_v38 = vpack.c.bf16 %v467_v36, %v465_v35 }
 0x39e   :  { %519 = vmatprep.subr.bf16.mxu0 %v476_v38 }
 0x39f   :  { %520 = vmatpush1.bf16.msra.mxu0 %v475_v37 }
 0x3a2   :  { %1346 = vmatmul.mubr.msk.bf16.vlgmr.msra.gmra.mrb[12].mxu0 %vm228_vm2, %v1418_v39 }
 0x3a3   :  { %559 = vmatprep.mubr.bf16.mxu0 %v1468_v4 }
 0x3aa   :  { %1347 = vmatmul.mubr.msk.bf16.gmra.mrb[16].mxu0 %vm228_vm2, %v1419_v40 }
 0x3ab   :  { %722 = vmatprep.mubr.bf16.mxu0 %v1468_v4 }
 0x475   :  { %v551_v42 = vpop.f32.mrb[12].mxu0 }
 0x476   :  { %v552_v43 = vadd.f32 %v551_v42, %v484_v41  ;;  %v553_v44 = vpop.f32.mrb[13].mxu0 }
 0x477   :  { %v554_v46 = vadd.f32 %v553_v44, %v484_v41  ;;  %v555_v47 = vpop.f32.mrb[14].mxu0 }
 0x478   :  { %v556_v48 = vadd.f32 %v555_v47, %v489_v45  ;;  %v557_v49 = vpop.f32.mrb[15].mxu0  ;;  %v570_v51 = vmax.f32 %v552_v43, 0.0  ;;  %v666_v47 = vpop.permute.xlu1 %665 }
 0x479   :  { %v558_v50 = vadd.f32 %v557_v49, %v489_v45  ;;  %v571_v53 = vmax.f32 %v554_v46, 0.0 }
 0x47a   :  { %v572_v52 = vmax.f32 %v556_v48, 0.0 }
 0x47b   :  { %v573_v54 = vmax.f32 %v558_v50, 0.0 }
 0x47c   :  { %v580_v55 = vpack.c.bf16 %v572_v52, %v570_v51 }
 0x47d   :  { %v581_v57 = vpack.c.bf16 %v573_v54, %v571_v53  ;;  %v561_v58 = vpop.f32.mrb[16].mxu0 }
 0x47e   :  { %v562_v59 = vadd.f32 %v561_v58, %v494_v56  ;;  %v563_v61 = vpop.f32.mrb[17].mxu0 }
 0x47f   :  { %v564_v2 = vadd.f32 %v563_v61, %v494_v56  ;;  %v565_v3 = vpop.f32.mrb[18].mxu0  ;;  %593 = vmatprep.subr.bf16.mxu1 %v581_v57  ;;  %v1423_v61 = vld [vmem:[%s1799_s3 + $0x28] sm:$0xff]  }
 0x480   :  { %v566_v5 = vadd.f32 %v565_v3, %v499_v63  ;;  %v567_v6 = vpop.f32.mrb[19].mxu0  ;;  %594 = vmatpush1.bf16.msra.mxu1 %v580_v55  ;;  %v574_v8 = vmax.f32 %v562_v59, 0.0  ;;  %v1422_v59 = vld [vmem:[%s1799_s3 + $0x20] sm:$0xff]  }
 0x481   :  { %v568_v7 = vadd.f32 %v567_v6, %v499_v63  ;;  %v575_v10 = vmax.f32 %v564_v2, 0.0  ;;  %v772_v6 = vpop.permute.xlu1 %771 }
 0x482   :  { %v576_v9 = vmax.f32 %v566_v5, 0.0 }
 0x483   :  { %v577_v11 = vmax.f32 %v568_v7, 0.0 }
 0x484   :  { %v582_v12 = vpack.c.bf16 %v576_v9, %v574_v8 }
 0x485   :  { %v583_v13 = vpack.c.bf16 %v577_v11, %v575_v10 }
 0x487   :  { %595 = vmatprep.subr.bf16.mxu1 %v583_v13 }
 0x488   :  { %596 = vmatpush1.bf16.msra.mxu1 %v582_v12 }
 0x48b   :  { %1350 = vmatmul.mubr.msk.bf16.vlgmr.msra.gmra.mrb[16].mxu1 %vm228_vm2, %v1348_v14 }
 0x48c   :  { %832 = vmatprep.mubr.bf16.mxu1 %v1468_v4 }
 0x55e   :  { %v627_v16 = vpop.f32.mrb[16].mxu1 }
 0x55f   :  { %v628_v17 = vadd.f32 %v627_v16, %v588_v15  ;;  %v629_v18 = vpop.f32.mrb[17].mxu1 }
 0x560   :  { %v630_v19 = vadd.f32 %v629_v18, %v588_v15  ;;  %v631_v20 = vpop.f32.mrb[18].mxu1 }
 0x561   :  { %v1706_v21 = vadd.f32 %v628_v17, %v1516_v1  ;;  %v632_v22 = vpop.f32.mrb[19].mxu1  ;;  %v651_v1 = vpop.permute.xlu0 %650 }
 0x562   :  { %v1709_v23 = vadd.f32 %v630_v19, %v1511_v0  ;;  %v1421_v0 = vld [vmem:[%s1798_s2 + $0x28] sm:$0xff]  }
 0x563   :  { %v641_v24 = vpack.c.bf16 %v1706_v21, %v1706_v21 }
 0x564   :  { %v642_v25 = vpack.c.bf16 %v1709_v23, %v1709_v23 }
 0x565   :  { %v685_v26 = vsel %vm118_vm0, %v641_v24, 0  ;;  %v661_v42 = vpop.permute.xlu0 %660  ;;  %v782_v24 = vpop.permute.xlu1 %781 }
 0x566   :  { %1361 = vmatprep.subr.msk.bf16.mxu0 %vm118_vm0, %v642_v25 }
 0x567   :  { %691 = vmatpush1.bf16.msra.mxu0 %v685_v26 }
 0x569   :  { %v767_v63 = vpop.permute.xlu0 %766 }
 0x56a   :  { %1362 = vmatmul.mubr.msk.bf16.vlgmr.msra.gmra.mrb[20].mxu0 %vm111_vm1, %v1420_v27 }
 0x56b   :  { %732 = vmatprep.mubr.bf16.mxu0 %v1468_v4 }
 0x56d   :  { %v777_v17 = vpop.permute.xlu0 %776 }
 0x572   :  { %1363 = vmatmul.mubr.msk.bf16.gmra.mrb[24].mxu0 %vm111_vm1, %v1421_v0 }
 0x573   :  { %908 = vmatprep.mubr.bf16.mxu0 %v1468_v4 }
 0x63d   :  { %v724_v28 = vpop.f32.mrb[20].mxu0 }
 0x63e   :  { %v725_v29 = vadd.f32 %v724_v28, %v651_v1  ;;  %v726_v30 = vpop.f32.mrb[21].mxu0 }
 0x63f   :  { %v727_v32 = vadd.f32 %v726_v30, %v651_v1  ;;  %v728_v33 = vpop.f32.mrb[22].mxu0 }
 0x640   :  { %v729_v34 = vadd.f32 %v728_v33, %v656_v31  ;;  %v730_v35 = vpop.f32.mrb[23].mxu0  ;;  %v743_v37 = vmax.f32 %v725_v29, 0.0 }
 0x641   :  { %v731_v36 = vadd.f32 %v730_v35, %v656_v31  ;;  %v744_v39 = vmax.f32 %v727_v32, 0.0  ;;  %v871_v35 = vpop.permute.xlu0 %870 }
 0x642   :  { %v745_v38 = vmax.f32 %v729_v34, 0.0  ;;  %v1376_v34 = vld [vmem:[%s1800_s4 + $0x8] sm:$0xf] }
 0x643   :  { %v746_v40 = vmax.f32 %v731_v36, 0.0 }
 0x644   :  { %v756_v41 = vpack.c.bf16 %v745_v38, %v743_v37 }
 0x645   :  { %v757_v43 = vpack.c.bf16 %v746_v40, %v744_v39  ;;  %v734_v44 = vpop.f32.mrb[24].mxu0 }
 0x646   :  { %v735_v45 = vadd.f32 %v734_v44, %v661_v42  ;;  %v736_v46 = vpop.f32.mrb[25].mxu0 }
 0x647   :  { %v737_v48 = vadd.f32 %v736_v46, %v661_v42  ;;  %v738_v49 = vpop.f32.mrb[26].mxu0  ;;  %800 = vmatprep.subr.bf16.mxu1 %v757_v43 }
 0x648   :  { %v739_v50 = vadd.f32 %v738_v49, %v666_v47  ;;  %v740_v51 = vpop.f32.mrb[27].mxu0  ;;  %801 = vmatpush1.bf16.msra.mxu1 %v756_v41  ;;  %v747_v53 = vmax.f32 %v735_v45, 0.0 }
 0x649   :  { %v741_v52 = vadd.f32 %v740_v51, %v666_v47  ;;  %v748_v55 = vmax.f32 %v737_v48, 0.0  ;;  %v1424_v47 = vld [vmem:[%s1798_s2 + $0x30] sm:$0xff]   ;;  %v939_v51 = vpop.permute.xlu0 %938 }
 0x64a   :  { %v749_v54 = vmax.f32 %v739_v50, 0.0 }
 0x64b   :  { %v750_v56 = vmax.f32 %v741_v52, 0.0 }
 0x64c   :  { %v758_v57 = vpack.c.bf16 %v749_v54, %v747_v53 }
 0x64d   :  { %v759_v58 = vpack.c.bf16 %v750_v56, %v748_v55 }
 0x64f   :  { %802 = vmatprep.subr.bf16.mxu1 %v759_v58 }
 0x650   :  { %803 = vmatpush1.bf16.msra.mxu1 %v758_v57 }
 0x653   :  { %1374 = vmatmul.mubr.msk.bf16.vlgmr.msra.gmra.mrb[20].mxu1 %vm228_vm2, %v1422_v59 }
 0x654   :  { %842 = vmatprep.mubr.bf16.mxu1 %v1468_v4 }
 0x65b   :  { %1375 = vmatmul.mubr.msk.bf16.gmra.mrb[24].mxu1 %vm228_vm2, %v1423_v61 }
 0x65c   :  { %1005 = vmatprep.mubr.bf16.mxu1 %v1468_v4 }
 0x726   :  { %v834_v2 = vpop.f32.mrb[20].mxu1 }
 0x727   :  { %v835_v3 = vadd.f32 %v834_v2, %v767_v63  ;;  %v836_v5 = vpop.f32.mrb[21].mxu1 }
 0x728   :  { %v837_v7 = vadd.f32 %v836_v5, %v767_v63  ;;  %v838_v8 = vpop.f32.mrb[22].mxu1 }
 0x729   :  { %v839_v9 = vadd.f32 %v838_v8, %v772_v6  ;;  %v840_v10 = vpop.f32.mrb[23].mxu1  ;;  %v853_v12 = vmax.f32 %v835_v3, 0.0  ;;  %v949_v8 = vpop.permute.xlu0 %948 }
 0x72a   :  { %v841_v11 = vadd.f32 %v840_v10, %v772_v6  ;;  %v854_v14 = vmax.f32 %v837_v7, 0.0 }
 0x72b   :  { %v855_v13 = vmax.f32 %v839_v9, 0.0 }
 0x72c   :  { %v856_v15 = vmax.f32 %v841_v11, 0.0 }
 0x72d   :  { %v863_v16 = vpack.c.bf16 %v855_v13, %v853_v12 }
 0x72e   :  { %v864_v18 = vpack.c.bf16 %v856_v15, %v854_v14  ;;  %v844_v19 = vpop.f32.mrb[24].mxu1 }
 0x72f   :  { %v845_v20 = vadd.f32 %v844_v19, %v777_v17  ;;  %v846_v22 = vpop.f32.mrb[25].mxu1 }
 0x730   :  { %v847_v25 = vadd.f32 %v846_v22, %v777_v17  ;;  %v848_v26 = vpop.f32.mrb[26].mxu1  ;;  %876 = vmatprep.subr.bf16.mxu0 %v864_v18  ;;  %v1427_v22 = vld [vmem:[%s1799_s3 + $0x38] sm:$0xff]  }
 0x731   :  { %v849_v27 = vadd.f32 %v848_v26, %v782_v24  ;;  %v850_v0 = vpop.f32.mrb[27].mxu1  ;;  %877 = vmatpush1.bf16.msra.mxu0 %v863_v16  ;;  %v857_v28 = vmax.f32 %v845_v20, 0.0  ;;  %v1426_v20 = vld [vmem:[%s1799_s3 + $0x30] sm:$0xff]  }
 0x732   :  { %v851_v1 = vadd.f32 %v850_v0, %v782_v24  ;;  %v858_v30 = vmax.f32 %v847_v25, 0.0  ;;  %v1055_v0 = vpop.permute.xlu0 %1054 }
 0x733   :  { %v859_v29 = vmax.f32 %v849_v27, 0.0 }
 0x734   :  { %v860_v31 = vmax.f32 %v851_v1, 0.0 }
 0x735   :  { %v865_v32 = vpack.c.bf16 %v859_v29, %v857_v28 }
 0x736   :  { %v866_v33 = vpack.c.bf16 %v860_v31, %v858_v30 }
 0x738   :  { %878 = vmatprep.subr.bf16.mxu0 %v866_v33 }
 0x739   :  { %879 = vmatpush1.bf16.msra.mxu0 %v865_v32 }
 0x73c   :  { %1378 = vmatmul.mubr.msk.bf16.vlgmr.msra.gmra.mrb[28].mxu0 %vm228_vm2, %v1376_v34 }
 0x73d   :  { %1115 = vmatprep.mubr.bf16.mxu0 %v1468_v4 }
 0x80f   :  { %v910_v36 = vpop.f32.mrb[28].mxu0 }
 0x810   :  { %v911_v37 = vadd.f32 %v910_v36, %v871_v35  ;;  %v912_v38 = vpop.f32.mrb[29].mxu0 }
 0x811   :  { %v913_v39 = vadd.f32 %v912_v38, %v871_v35  ;;  %v914_v40 = vpop.f32.mrb[30].mxu0 }
 0x812   :  { %v1743_v41 = vadd.f32 %v911_v37, %v1670_v60  ;;  %v915_v42 = vpop.f32.mrb[31].mxu0  ;;  %v1425_v60 = vld [vmem:[%s1798_s2 + $0x38] sm:$0xff]  }
 0x813   :  { %v1746_v43 = vadd.f32 %v913_v39, %v1672_v62  ;;  %v934_v62 = vpop.permute.xlu1 %933  ;;  %v1065_v42 = vpop.permute.xlu0 %1064 }
 0x814   :  { %v924_v44 = vpack.c.bf16 %v1743_v41, %v1743_v41 }
 0x815   :  { %v925_v45 = vpack.c.bf16 %v1746_v43, %v1746_v43 }
 0x816   :  { %v968_v46 = vsel %vm118_vm0, %v924_v44, 0 }
 0x817   :  { %1389 = vmatprep.subr.msk.bf16.mxu1 %vm118_vm0, %v925_v45  ;;  %v944_v2 = vpop.permute.xlu1 %943 }
 0x818   :  { %974 = vmatpush1.bf16.msra.mxu1 %v968_v46 }
 0x81b   :  { %1390 = vmatmul.mubr.msk.bf16.vlgmr.msra.gmra.mrb[28].mxu1 %vm111_vm1, %v1424_v47  ;;  %v1050_v24 = vpop.permute.xlu1 %1049 }
 0x81c   :  { %1015 = vmatprep.mubr.bf16.mxu1 %v1468_v4 }
 0x81f   :  { %v1060_v36 = vpop.permute.xlu1 %1059 }
 0x823   :  { %1391 = vmatmul.mubr.msk.bf16.gmra.mrb[32].mxu1 %vm111_vm1, %v1425_v60 }
 0x824   :  { %1191 = vmatprep.mubr.bf16.mxu1 %v1468_v4 }
 0x8ee   :  { %v1007_v48 = vpop.f32.mrb[28].mxu1 }
 0x8ef   :  { %v1008_v49 = vadd.f32 %v1007_v48, %v934_v62  ;;  %v1009_v50 = vpop.f32.mrb[29].mxu1 }
 0x8f0   :  { %v1010_v52 = vadd.f32 %v1009_v50, %v934_v62  ;;  %v1011_v53 = vpop.f32.mrb[30].mxu1 }
 0x8f1   :  { %v1012_v54 = vadd.f32 %v1011_v53, %v939_v51  ;;  %v1013_v55 = vpop.f32.mrb[31].mxu1  ;;  %v1026_v57 = vmax.f32 %v1008_v49, 0.0  ;;  %v1404_v53 = vld [vmem:[%s1800_s4 + $0xc] sm:$0xf] }
 0x8f2   :  { %v1014_v56 = vadd.f32 %v1013_v55, %v939_v51  ;;  %v1027_v59 = vmax.f32 %v1010_v52, 0.0 }
 0x8f3   :  { %v1028_v58 = vmax.f32 %v1012_v54, 0.0  ;;  %v1154_v54 = vpop.permute.xlu1 %1153 }
 0x8f4   :  { %v1029_v61 = vmax.f32 %v1014_v56, 0.0 }
 0x8f5   :  { %v1039_v63 = vpack.c.bf16 %v1028_v58, %v1026_v57 }
 0x8f6   :  { %v1040_v3 = vpack.c.bf16 %v1029_v61, %v1027_v59  ;;  %v1017_v5 = vpop.f32.mrb[32].mxu1 }
 0x8f7   :  { %v1018_v6 = vadd.f32 %v1017_v5, %v944_v2  ;;  %v1019_v7 = vpop.f32.mrb[33].mxu1  ;;  %v1212_v55 = vpop.permute.xlu1 %1211 }
 0x8f8   :  { %v1020_v9 = vadd.f32 %v1019_v7, %v944_v2  ;;  %v1021_v10 = vpop.f32.mrb[34].mxu1  ;;  %1083 = vmatprep.subr.bf16.mxu0 %v1040_v3  ;;  %v1216_v56 = vmul.f32 %v1212_v55, %v1743_v41  ;;  %v1217_v57 = vmul.f32 %v1212_v55, %v1746_v43 }
 0x8f9   :  { %v1022_v11 = vadd.f32 %v1021_v10, %v949_v8  ;;  %v1023_v12 = vpop.f32.mrb[35].mxu1  ;;  %1084 = vmatpush1.bf16.msra.mxu0 %v1039_v63  ;;  %v1030_v14 = vmax.f32 %v1018_v6, 0.0 }
 0x8fa   :  { %v1024_v13 = vadd.f32 %v1023_v12, %v949_v8  ;;  %v1031_v16 = vmax.f32 %v1020_v9, 0.0  ;;  %v1220_v58 = vand.u32 2147483647, %v1216_v56  ;;  %v1221_v59 = vand.u32 2147483647, %v1217_v57  ;;  %v1207_v12 = vpop.permute.xlu0 %1206 }
 0x8fb   :  { %v1032_v15 = vmax.f32 %v1022_v11, 0.0  ;;  %v1269_v56 = vstv %s1796_s0 }
 0x8fc   :  { %v1033_v17 = vmax.f32 %v1024_v13, 0.0  ;;  %v1224_v61 = vsub.f32 0.0, %v1220_v58  ;;  %v1225_v63 = vsub.f32 0.0, %v1221_v59 }
 0x8fd   :  { %v1041_v18 = vpack.c.bf16 %v1032_v15, %v1030_v14 }
 0x8fe   :  { %v1042_v19 = vpack.c.bf16 %v1033_v17, %v1031_v16  ;;  %v1230_v2 = vmul.f32 1.442695, %v1224_v61  ;;  %v1232_v3 = vmul.f32 1.442695, %v1225_v63 }
 0x900   :  { %1085 = vmatprep.subr.bf16.mxu0 %v1042_v19  ;;  %1428 = vpow2.f32 %v1230_v2 }
 0x901   :  { %1086 = vmatpush1.bf16.msra.mxu0 %v1041_v18  ;;  %1430 = vpow2.f32 %v1232_v3 }
 0x904   :  { %1402 = vmatmul.mubr.msk.bf16.vlgmr.msra.gmra.mrb[32].mxu0 %vm228_vm2, %v1426_v20 }
 0x905   :  { %1125 = vmatprep.mubr.bf16.mxu0 %v1468_v4 }
 0x90a   :  { %v1429_v20 = vpop.eup %1428 }
 0x90c   :  { %1403 = vmatmul.mubr.msk.bf16.gmra.mrb[36].mxu0 %vm228_vm2, %v1427_v22  ;;  %v1431_v22 = vpop.eup %1430 }
 0x9d7   :  { %v1117_v25 = vpop.f32.mrb[32].mxu0 }
 0x9d8   :  { %v1118_v26 = vadd.f32 %v1117_v25, %v1050_v24  ;;  %v1119_v27 = vpop.f32.mrb[33].mxu0  ;;  %v1237_v25 = vadd.f32 1.0, %v1431_v22 }
 0x9d9   :  { %v1120_v1 = vadd.f32 %v1119_v27, %v1050_v24  ;;  %v1121_v28 = vpop.f32.mrb[34].mxu0  ;;  %v1236_v24 = vadd.f32 1.0, %v1429_v20 }
 0x9da   :  { %v1122_v29 = vadd.f32 %v1121_v28, %v1055_v0  ;;  %v1123_v30 = vpop.f32.mrb[35].mxu0  ;;  %v1136_v32 = vmax.f32 %v1118_v26, 0.0 }
 0x9db   :  { %v1124_v31 = vadd.f32 %v1123_v30, %v1055_v0  ;;  %v1137_v34 = vmax.f32 %v1120_v1, 0.0 }
 0x9dc   :  { %v1138_v33 = vmax.f32 %v1122_v29, 0.0 }
 0x9dd   :  { %v1139_v4 = vmax.f32 %v1124_v31, 0.0 }
 0x9de   :  { %v1146_v35 = vpack.c.bf16 %v1138_v33, %v1136_v32 }
 0x9df   :  { %v1147_v37 = vpack.c.bf16 %v1139_v4, %v1137_v34  ;;  %v1127_v38 = vpop.f32.mrb[36].mxu0 }
 0x9e0   :  { %v1128_v39 = vadd.f32 %v1127_v38, %v1060_v36  ;;  %v1129_v40 = vpop.f32.mrb[37].mxu0 }
 0x9e1   :  { %v1130_v44 = vadd.f32 %v1129_v40, %v1060_v36  ;;  %v1131_v45 = vpop.f32.mrb[38].mxu0  ;;  %1159 = vmatprep.subr.bf16.mxu1 %v1147_v37 }
 0x9e2   :  { %v1132_v46 = vadd.f32 %v1131_v45, %v1065_v42  ;;  %v1133_v47 = vpop.f32.mrb[39].mxu0  ;;  %1160 = vmatpush1.bf16.msra.mxu1 %v1146_v35  ;;  %v1140_v62 = vmax.f32 %v1128_v39, 0.0 }
 0x9e3   :  { %v1134_v60 = vadd.f32 %v1133_v47, %v1065_v42  ;;  %v1141_v49 = vmax.f32 %v1130_v44, 0.0 }
 0x9e4   :  { %v1142_v48 = vmax.f32 %v1132_v46, 0.0 }
 0x9e5   :  { %v1143_v50 = vmax.f32 %v1134_v60, 0.0 }
 0x9e6   :  { %v1148_v51 = vpack.c.bf16 %v1142_v48, %v1140_v62 }
 0x9e7   :  { %v1149_v52 = vpack.c.bf16 %v1143_v50, %v1141_v49  ;;  %v1469_v49 = vmov 1966171168  }
 0x9e8   :  { %v1276_v50 = vunpack.c.l.s4 %v1469_v49 }
 0x9e9   :  { %1161 = vmatprep.subr.bf16.mxu1 %v1149_v52 }
 0x9ea   :  { %1162 = vmatpush1.bf16.msra.mxu1 %v1148_v51  ;;  %v1278_v51 = vlaneseq  ;;  %v1277_v57 = vunpack.c.0.s8 %v1276_v50 }
 0x9ec   :  { %v1279_v58 = vshrl.u32 %v1278_v51, 7  ;;  %vm1292_vm3 = vcmp.lt.s32.totalorder %v1278_v51, 256 }
 0x9ed   :  { %1406 = vmatmul.mubr.msk.bf16.vlgmr.msra.gmra.mrb[36].mxu1 %vm228_vm2, %v1404_v53 }
 0x9ee   :  { %v1280_v3 = vsub.s32 %v1277_v57, %v1279_v58 }
 0xac0   :  { %v1193_v5 = vpop.f32.mrb[36].mxu1 }
 0xac1   :  { %v1194_v6 = vadd.f32 %v1193_v5, %v1154_v54  ;;  %v1195_v7 = vpop.f32.mrb[37].mxu1 }
 0xac2   :  { %v1196_v8 = vadd.f32 %v1195_v7, %v1154_v54  ;;  %v1197_v9 = vpop.f32.mrb[38].mxu1 }
 0xac3   :  { %v1200_v10 = vadd.f32 %v1194_v6, %v1706_v21  ;;  %v1198_v11 = vpop.f32.mrb[39].mxu1 }
 0xac4   :  { %v1201_v41 = vadd.f32 %v1196_v8, %v1709_v23 }
 0xac5   :  { %v1214_v43 = vmul.f32 %v1207_v12, %v1200_v10 }
 0xac6   :  { %v1215_v13 = vmul.f32 %v1207_v12, %v1201_v41 }
 0xac7   :  { %v1218_v14 = vand.u32 2147483647, %v1214_v43 }
 0xac8   :  { %v1219_v15 = vand.u32 2147483647, %v1215_v13 }
 0xac9   :  { %v1222_v16 = vsub.f32 0.0, %v1218_v14 }
 0xaca   :  { %v1223_v17 = vsub.f32 0.0, %v1219_v15 }
 0xacb   :  { %v1226_v18 = vmul.f32 1.442695, %v1222_v16 }
 0xacc   :  { %v1228_v19 = vmul.f32 1.442695, %v1223_v17 }
 0xacd   :  { %1432 = vpow2.f32 %v1226_v18 }
 0xace   :  { %1434 = vpow2.f32 %v1228_v19 }
 0xacf   :  { %1436 = vlog2.f32 %v1236_v24 }
 0xad0   :  { %1438 = vlog2.f32 %v1237_v25 }
 0xad7   :  { %v1433_v21 = vpop.eup %1432 }
 0xad8   :  { %v1435_v26 = vpop.eup %1434  ;;  %v1234_v27 = vadd.f32 1.0, %v1433_v21 }
 0xad9   :  { %v1235_v23 = vadd.f32 1.0, %v1435_v26  ;;  %v1437_v0 = vpop.eup %1436 }
 0xada   :  { %1440 = vlog2.f32 %v1234_v27  ;;  %v1439_v1 = vpop.eup %1438  ;;  %v1243_v28 = vmul.f32 0.6931472, %v1437_v0 }
 0xadb   :  { %1442 = vlog2.f32 %v1235_v23  ;;  %v1245_v29 = vmul.f32 0.6931472, %v1439_v1 }
 0xadc   :  { %v1248_v32 = vmul.f32 2.0, %v1243_v28 }
 0xadd   :  { %v1249_v34 = vmul.f32 2.0, %v1245_v29 }
 0xade   :  { %v1252_v37 = vsub.f32 %v1224_v61, %v1248_v32 }
 0xadf   :  { %v1253_v39 = vsub.f32 %v1225_v63, %v1249_v34 }
 0xae4   :  { %v1441_v30 = vpop.eup %1440 }
 0xae5   :  { %v1443_v31 = vpop.eup %1442  ;;  %v1239_v33 = vmul.f32 0.6931472, %v1441_v30 }
 0xae6   :  { %v1241_v4 = vmul.f32 0.6931472, %v1443_v31 }
 0xae7   :  { %v1246_v35 = vmul.f32 2.0, %v1239_v33 }
 0xae8   :  { %v1247_v36 = vmul.f32 2.0, %v1241_v4 }
 0xae9   :  { %v1250_v38 = vsub.f32 %v1222_v16, %v1246_v35 }
 0xaea   :  { %v1251_v40 = vsub.f32 %v1223_v17, %v1247_v36 }
 0xaeb   :  { %v1254_v42 = vadd.f32 %v1252_v37, %v1250_v38 }
 0xaec   :  { %v1261_v44 = vadd.f32 %v1253_v39, %v1251_v40 }
 0xaed   :  { %v1255_v45 = vrot.slane %v1254_v42, 4 }
 0xaee   :  { %v1262_v46 = vrot.slane %v1261_v44, 4 }
 0xaef   :  { %v1256_v47 = vadd.f32 %v1255_v45, %v1254_v42 }
 0xaf0   :  { %v1263_v60 = vadd.f32 %v1262_v46, %v1261_v44 }
 0xaf1   :  { %v1257_v62 = vrot.slane %v1256_v47, 2 }
 0xaf2   :  { %v1264_v48 = vrot.slane %v1263_v60, 2 }
 0xaf3   :  { %v1258_v52 = vadd.f32 %v1257_v62, %v1256_v47 }
 0xaf4   :  { %v1265_v53 = vadd.f32 %v1264_v48, %v1263_v60 }
 0xaf5   :  { %v1259_v54 = vrot.slane %v1258_v52, 1 }
 0xaf6   :  { %v1266_v55 = vrot.slane %v1265_v53, 1 }
 0xaf7   :  { %v1260_v59 = vadd.f32 %v1259_v54, %v1258_v52 }
 0xaf8   :  { %v1267_v61 = vadd.f32 %v1266_v55, %v1265_v53 }
 0xaf9   :  { %v1270_v63 = vadd.f32 %v1269_v56, %v1260_v59 }
 0xafa   :  { %v1271_v2 = vadd.f32 %v1269_v56, %v1267_v61 }
 0xafc   :  { %v1274_v5 = vcombine.low %v1270_v63, %v1271_v2 }
 0xafe   :  { %v1281_v6 = vrot.slane %v1274_v5, %v1280_v3 }
 0xb00   :  { %v1288_v7 = vrot.slane %v1281_v6, %v1280_v3 }
 0xb02   :  { %1294 = vst.msk [vmem:[#allocation4] sm:$0x3] %vm1292_vm3, %v1288_v7 }
 0xb03   :  { %1455 = shalt.err (!%p1452_p4)
}
 0xb04   :  { %s1456_s26 = scalar_lea.hbm %s1803_s7, 32 }
 0xb05   :  { %p1457_p5 = scmp.ne.s32.totalorder %s1803_s7, %s1456_s26  ;;  %p1460_p6 = scmp.lt.u32.totalorder %s1456_s26, %s1803_s7 }
 0xb07   :  { %p1462_p7 = pnand %p1460_p6, %p1457_p5 }
 0xb09   :  { %1465 = shalt.err (!%p1462_p7)
}
 0xb0a   :  { %1304 = dma.vmem_to_hbm [thread:$0]  %s1302_s23, 32, %s1803_s7, [#allocation5]  }
 0xb0b   :  { %1466 = dma.done.wait [#allocation5], 32  }
 0xb0c   :  { %1467 = vsyncadd [#allocation5], 4294967264 }
 0xb0d   :  { %1308 = vsyncpa [#allocation5], 1 }

</bundles_post_ra>
